<compile_context>
chip_gen: v6e
topology: v6e:2x2x1
jax: 0.10.0
libtpu: 0.0.40
codegen_flags: <defaults>
</compile_context>

<pallas_src>
import math
from typing import NamedTuple

import jax
import jax.numpy as jnp
from jax.experimental import pallas as pl
from jax.experimental.pallas import tpu as pltpu


# ---------------------------------------------------------------------------
# Kernels
# ---------------------------------------------------------------------------
def _linear_tanh_kernel_f32out(x_ref, w_ref, o_ref):
    """f32 output: accumulate directly into the resident output block."""

    @pl.when(pl.program_id(2) == 0)
    def _init():
        o_ref[...] = jnp.zeros_like(o_ref)

    # Canonical (tm, tk) @ (tk, tn) MXU matmul, f32 accumulation. x is cast to
    # the (bf16) weight dtype in-kernel so no separate XLA cast pass is needed.
    o_ref[...] += jnp.dot(
        x_ref[...].astype(w_ref.dtype),
        w_ref[...],
        preferred_element_type=jnp.float32,
    )

    @pl.when(pl.program_id(2) == pl.num_programs(2) - 1)
    def _finalize():
        o_ref[...] = jnp.tanh(o_ref[...])   # f32 tanh epilogue (EUP)


def _linear_tanh_kernel_acc(x_ref, w_ref, o_ref, acc_ref):
    """Non-f32 output: keep an f32 VMEM accumulator, cast once on writeback."""

    @pl.when(pl.program_id(2) == 0)
    def _init():
        acc_ref[...] = jnp.zeros_like(acc_ref)

    acc_ref[...] += jnp.dot(
        x_ref[...].astype(w_ref.dtype),
        w_ref[...],
        preferred_element_type=jnp.float32,
    )

    @pl.when(pl.program_id(2) == pl.num_programs(2) - 1)
    def _finalize():
        o_ref[...] = jnp.tanh(acc_ref[...]).astype(o_ref.dtype)


# ---------------------------------------------------------------------------
# Parameter preparation (one-time, outside the per-call path)
# ---------------------------------------------------------------------------
class LinearExtractorParams(NamedTuple):
    w_kn: jax.Array       # (K_pad, N_pad) weight, transposed / padded / bf16
    in_features: int      # K = width * height
    out_features: int     # N = out_size


def _round_up(v, m):
    return ((v + m - 1) // m) * m


def prepare_linear_extractor_params(weight, *, use_bf16=True):
    """One-time weight prep (do at parameter-load time, NOT per forward call):
    transpose nn.Linear's (N, K) layout to (K, N), zero-pad both dims to
    multiples of 128 (lane-dense output, clean K tiling) and cast to bf16."""
    N, K = weight.shape
    K_pad = _round_up(K, 128)
    N_pad = _round_up(N, 128)
    w_kn = jnp.zeros((K_pad, N_pad), weight.dtype).at[:K, :N].set(weight.T)
    if use_bf16:
        w_kn = w_kn.astype(jnp.bfloat16)
    return LinearExtractorParams(w_kn=w_kn, in_features=K, out_features=N)


def init_linear_extractor_weight(key, in_shape, out_size, dtype=jnp.float32):
    """nn.Linear default init (uniform +/- 1/sqrt(fan_in)), PyTorch layout."""
    width, height = in_shape
    fan_in = width * height
    bound = 1.0 / math.sqrt(fan_in)
    return jax.random.uniform(
        key, (out_size, fan_in), dtype=dtype, minval=-bound, maxval=bound)


# ---------------------------------------------------------------------------
# Tile selection (generation-aware VMEM budget)
# ---------------------------------------------------------------------------
def _vmem_capacity_bytes():
    try:
        return int(pltpu.get_tpu_info().vmem_capacity_bytes)
    except Exception:
        return 64 * 1024 * 1024   # conservative (v7x-sized) fallback


def _pick_tiles(B_pad, K_pad, N_pad):
    big_vmem = _vmem_capacity_bytes() >= 96 * 1024 * 1024   # v5e / v6e (128 MiB)
    tm_cap = 512 if big_vmem else 256
    tn_cap = 512
    tk_cap = 4096 if big_vmem else 2048
    vmem_limit = (64 if big_vmem else 32) * 1024 * 1024
    # Worst case (big_vmem): 2*(512*4096*4 + 4096*512*2 + 512*512*4) ~ 26 MiB.
    # Worst case (v7x):      2*(256*2048*4 + 2048*512*2 + 256*512*4) ~  9 MiB.

    tm = B_pad if B_pad <= tm_cap else tm_cap
    tn = N_pad if N_pad <= tn_cap else tn_cap

    # Largest multiple-of-128 divisor of K_pad that is <= tk_cap. K_pad is a
    # multiple of 128, so 128 always divides -> no full-K fallback.
    if K_pad <= tk_cap:
        tk = K_pad
    else:
        tk = 128
        cand = (tk_cap // 128) * 128
        while cand >= 128:
            if K_pad % cand == 0:
                tk = cand
                break
            cand -= 128

    # v7x megacore: guarantee >= 2 parallel blocks when possible so the grid
    # can be sharded across both TensorCores.
    if pl.cdiv(B_pad, tm) * pl.cdiv(N_pad, tn) == 1 and N_pad >= 256:
        cand = (N_pad // 2 // 128) * 128
        while cand >= 128 and N_pad % cand != 0:
            cand -= 128
        if cand >= 128:
            tn = cand

    return tm, tn, tk, vmem_limit


# ---------------------------------------------------------------------------
# Forward
# ---------------------------------------------------------------------------
def linear_extractor_forward(x, params: LinearExtractorParams):
    """x: (B, in_features). Returns tanh(x @ W.T): (B, out_features)."""
    B, K = x.shape
    assert K == params.in_features
    w_kn = params.w_kn
    K_pad, N_pad = w_kn.shape

    # Pad batch to a sublane multiple and K up to the padded weight K (zero
    # padding does not change the matmul); padded rows/cols sliced off after.
    B_pad = _round_up(max(B, 8), 8)
    if (B_pad, K_pad) != (B, K):
        x_p = jnp.zeros((B_pad, K_pad), x.dtype).at[:B, :K].set(x)
    else:
        x_p = x

    tm, tn, tk, vmem_limit = _pick_tiles(B_pad, K_pad, N_pad)
    grid = (pl.cdiv(B_pad, tm), pl.cdiv(N_pad, tn), K_pad // tk)  # reduction last

    out_dtype = x.dtype
    f32_out = out_dtype == jnp.float32
    kernel = _linear_tanh_kernel_f32out if f32_out else _linear_tanh_kernel_acc
    scratch = [] if f32_out else [pltpu.VMEM((tm, tn), jnp.float32)]

    cost = pl.CostEstimate(
        flops=2 * B_pad * K_pad * N_pad,
        transcendentals=B_pad * N_pad,
        bytes_accessed=(x_p.size * x_p.dtype.itemsize
                        + w_kn.size * w_kn.dtype.itemsize
                        + B_pad * N_pad * jnp.dtype(out_dtype).itemsize),
    )

    out_p = pl.pallas_call(
        kernel,
        out_shape=jax.ShapeDtypeStruct((B_pad, N_pad), out_dtype),
        grid_spec=pltpu.PrefetchScalarGridSpec(
            num_scalar_prefetch=0,
            grid=grid,
            in_specs=[
                pl.BlockSpec((tm, tk), lambda i, j, k: (i, k)),   # x row tile
                pl.BlockSpec((tk, tn), lambda i, j, k: (k, j)),   # W (K,N) tile
            ],
            out_specs=pl.BlockSpec((tm, tn), lambda i, j, k: (i, j)),
            scratch_shapes=scratch,
        ),
        compiler_params=pltpu.CompilerParams(
            dimension_semantics=("parallel", "parallel", "arbitrary"),
            vmem_limit_bytes=vmem_limit,
        ),
        cost_estimate=cost,
    )(x_p, w_kn)

    return out_p[:B, :params.out_features]


# ---------------------------------------------------------------------------
# Demo / self-test
# ---------------------------------------------------------------------------
if __name__ == "__main__":
    batch = 8
    in_shape = (16, 8)          # width, height -> 128 input features
    out_size = 128
    in_features = in_shape[0] * in_shape[1]

    key = jax.random.PRNGKey(0)
    kx, kw = jax.random.split(key)

    x = jax.random.normal(kx, (batch, in_features), dtype=jnp.float32)
    weight = init_linear_extractor_weight(kw, in_shape, out_size)

    # One-time parameter prep (transpose + pad + persistent bf16 cast).
    params = prepare_linear_extractor_params(weight, use_bf16=True)

    out = jax.block_until_ready(linear_extractor_forward(x, params))

    # Plain-JAX f32 reference; tolerance loosened for bf16 MXU inputs
    # (f32 accumulation + f32 tanh epilogue in the kernel).
    ref = jnp.tanh(x @ weight.T)
    assert out.shape == (batch, out_size)
    max_err = float(jnp.max(jnp.abs(out - ref)))
    assert jnp.allclose(out, ref, atol=2e-2, rtol=2e-2), max_err

    print("KERNEL_OK")
</pallas_src>

<mosaic_0001>
module attributes {stable_mosaic.version = 11 : i64} {
  func.func @_linear_tanh_kernel_f32out(%arg0: i32, %arg1: i32, %arg2: i32, %arg3: memref<8x128xf32, #tpu.memory_space<vmem>>, %arg4: memref<128x128xbf16, #tpu.memory_space<vmem>>, %arg5: memref<8x128xf32, #tpu.memory_space<vmem>>) attributes {dimension_semantics = [#tpu.dimension_semantics<parallel>, #tpu.dimension_semantics<parallel>, #tpu.dimension_semantics<arbitrary>], iteration_bounds = array<i64: 1, 1, 1>, scalar_prefetch = 0 : i64, scratch_operands = 0 : i64, tpu.core_type = #tpu.core_type<tc>, window_params = [{transform_indices = @transform_0, window_bounds = array<i64: 8, 128>}, {transform_indices = @transform_1, window_bounds = array<i64: 128, 128>}, {transform_indices = @transform_2, window_bounds = array<i64: 8, 128>}]} {
    %c0_i32 = arith.constant 0 : i32
    %0 = arith.cmpi eq, %arg2, %c0_i32 : i32
    %1 = arith.extui %0 : i1 to i32
    %c0_i32_0 = arith.constant 0 : i32
    %2 = arith.cmpi ne, %1, %c0_i32_0 : i32
    scf.if %2 {
      %cst_10 = arith.constant 0.000000e+00 : f32
      %13 = vector.broadcast %cst_10 : f32 to vector<8x128xf32>
      %c0_11 = arith.constant 0 : index
      %c0_12 = arith.constant 0 : index
      %14 = vector.load %arg5[%c0_11, %c0_12] : memref<8x128xf32, #tpu.memory_space<vmem>>, vector<8x128xf32>
      tpu.vector_store %arg5[%c0_11, %c0_12], %13 {strides = array<i32>} : memref<8x128xf32, #tpu.memory_space<vmem>>, vector<8x128xf32>,
    } else {
    }
    %c0 = arith.constant 0 : index
    %c0_1 = arith.constant 0 : index
    %3 = vector.load %arg5[%c0, %c0_1] : memref<8x128xf32, #tpu.memory_space<vmem>>, vector<8x128xf32>
    %c0_2 = arith.constant 0 : index
    %c0_3 = arith.constant 0 : index
    %4 = vector.load %arg3[%c0_2, %c0_3] : memref<8x128xf32, #tpu.memory_space<vmem>>, vector<8x128xf32>
    %5 = arith.truncf %4 : vector<8x128xf32> to vector<8x128xbf16>
    %c0_4 = arith.constant 0 : index
    %c0_5 = arith.constant 0 : index
    %6 = vector.load %arg4[%c0_4, %c0_5] : memref<128x128xbf16, #tpu.memory_space<vmem>>, vector<128x128xbf16>
    %cst = arith.constant dense<0.000000e+00> : vector<8x128xf32>
    %7 = tpu.matmul %5, %6, %cst {dimension_numbers = #tpu.dot_dimension_numbers<[1], [0], [0], [1], [0, 0, 1, 1], [], []>} : vector<8x128xbf16>, vector<128x128xbf16>, vector<8x128xf32> -> vector<8x128xf32>
    %8 = arith.addf %3, %7 : vector<8x128xf32>
    %c0_6 = arith.constant 0 : index
    %c0_7 = arith.constant 0 : index
    %9 = vector.load %arg5[%c0_6, %c0_7] : memref<8x128xf32, #tpu.memory_space<vmem>>, vector<8x128xf32>
    tpu.vector_store %arg5[%c0_6, %c0_7], %8 {strides = array<i32>} : memref<8x128xf32, #tpu.memory_space<vmem>>, vector<8x128xf32>,
    %c0_i32_8 = arith.constant 0 : i32
    %10 = arith.cmpi eq, %arg2, %c0_i32_8 : i32
    %11 = arith.extui %10 : i1 to i32
    %c0_i32_9 = arith.constant 0 : i32
    %12 = arith.cmpi ne, %11, %c0_i32_9 : i32
    scf.if %12 {
      %c0_10 = arith.constant 0 : index
      %c0_11 = arith.constant 0 : index
      %13 = vector.load %arg5[%c0_10, %c0_11] : memref<8x128xf32, #tpu.memory_space<vmem>>, vector<8x128xf32>
      %14 = math.tanh %13 : vector<8x128xf32>
      %c0_12 = arith.constant 0 : index
      %c0_13 = arith.constant 0 : index
      %15 = vector.load %arg5[%c0_12, %c0_13] : memref<8x128xf32, #tpu.memory_space<vmem>>, vector<8x128xf32>
      tpu.vector_store %arg5[%c0_12, %c0_13], %14 {strides = array<i32>} : memref<8x128xf32, #tpu.memory_space<vmem>>, vector<8x128xf32>,
    } else {
    }
    return
  }
  func.func @transform_0(%arg0: i32, %arg1: i32, %arg2: i32) -> (i32, i32) {
    %c0_i32 = arith.constant 0 : i32
    return %arg0, %arg2 : i32, i32
  }
  func.func @transform_1(%arg0: i32, %arg1: i32, %arg2: i32) -> (i32, i32) {
    %c0_i32 = arith.constant 0 : i32
    return %arg2, %arg1 : i32, i32
  }
  func.func @transform_2(%arg0: i32, %arg1: i32, %arg2: i32) -> (i32, i32) {
    %c0_i32 = arith.constant 0 : i32
    return %arg0, %arg1 : i32, i32
  }
}

</mosaic_0001>

<bundles_post_ra>
// kernel: tpu_custom_call.1
= control target key start
LH: loop header
LB: loop body
LE: loop exit
PB: predicated region body
PF: predicated region fallthrough
CT: control target
= control target key end

     0   :  { %7 = vsyncpa [#allocation3], 0  ;;  %s326_s0 = inlined_call_operand.hbm [shape: f32[8,128], index: 0, kind: input, shape index: {}]   ;;  %s327_s1 = inlined_call_operand.hbm [shape: bf16[128,128], index: 1, kind: input, shape index: {}]   ;;  %s328_s2 = inlined_call_operand.hbm [shape: f32[8,128], index: 2, kind: output, shape index: {}]  }
   0x1   :  { %8 = vsyncpa [#allocation6], 0 }
   0x2   :  { %9 = vsyncpa [#allocation4], 0  ;;  %s295_s9 = smov [#allocation2]   ;;  %s296_s11 = smov [#allocation5]  }
   0x3   :  { %s16_s10 = sshll.u32 %s295_s9, 4  ;;  %s25_s12 = sshll.u32 %s296_s11, 4  ;;  %s17_s10 = int_to_ptr.vmem [resolvable:$true] %s16_s10  ;;  %s26_s12 = int_to_ptr.vmem [resolvable:$true] %s25_s12 }
   0x4   :  { %s237_s13 = scalar_lea.vmem %s17_s10, 128  ;;  %p242_p1 = scmp.lt.s32.totalorder %s17_s10, %s17_s10 }
   0x5   :  { %p238_p0 = scmp.ne.s32.totalorder %s17_s10, %s237_s13  ;;  %p243_p2 = scmp.lt.s32.totalorder %s237_s13, %s237_s13 }
   0x7   :  { %p244_p3 = por %p243_p2, %p242_p1 }
   0x9   :  { %p245_p4 = pnand %p244_p3, %p238_p0 }
   0xb   :  { %248 = shalt.err (!%p245_p4)
}
   0xc   :  { %19 = dma.hbm_to_vmem [thread:$0]  %s326_s0, 128, %s17_s10, [#allocation3]  }
   0xd   :  { %s257_s16 = scalar_lea.vmem %s26_s12, 1024  ;;  %p262_p6 = scmp.lt.s32.totalorder %s26_s12, %s26_s12 }
   0xe   :  { %p258_p5 = scmp.ne.s32.totalorder %s26_s12, %s257_s16  ;;  %p263_p7 = scmp.lt.s32.totalorder %s257_s16, %s257_s16 }
  0x10   :  { %p264_p8 = por %p263_p7, %p262_p6 }
  0x12   :  { %p265_p9 = pnand %p264_p8, %p258_p5 }
  0x14   :  { %268 = shalt.err (!%p265_p9)
}
  0x15   :  { %s297_s17 = smov 64   ;;  %s298_s18 = smov 4  }
  0x16   :  { %31 = dma.hbm_to_vmem [thread:$0]  %s327_s1, 1024, %s26_s12, [#allocation6], %s297_s17, %s297_s17, %s298_s18  }
  0x17   :  { %289 = dma.done.wait [#allocation3], 128  }
  0x18   :  { %290 = vsyncadd [#allocation3], 4294967168 }
  0x19   :  { %291 = dma.done.wait [#allocation6], 1024  }
  0x1a   :  { %292 = vsyncadd [#allocation6], 4294966272  ;;  %v299_v0 = vmov 0.0   ;;  %vm300_vm0 = vmmov 0   ;;  %v219_v1 = vld [vmem:[#allocation5 + $0x38] sm:$0xff]   ;;  %v220_v2 = vld [vmem:[#allocation5 + $0x30] sm:$0xff]  }
  0x1b   :  { %192 = vmatprep.subr.bf16.mxu0 %v299_v0  ;;  %208 = vmatprep.mubr.msk.bf16.mxu0 %vm300_vm0, %v299_v0  ;;  %v221_v3 = vld [vmem:[#allocation5 + $0x28] sm:$0xff]   ;;  %v222_v4 = vld [vmem:[#allocation5 + $0x20] sm:$0xff]   ;;  %v223_v5 = vld [vmem:[#allocation5 + $0x18] sm:$0xff]   ;;  %s301_s0 = smov [#allocation7]  }
  0x1c   :  { %193 = vmatpush3.bf16.msra.mxu0 %v219_v1  ;;  %v224_v6 = vld [vmem:[#allocation5 + $0x10] sm:$0xff]   ;;  %v225_v7 = vld [vmem:[#allocation5 + $0x8] sm:$0xff]   ;;  %v226_v8 = vld [vmem:[#allocation5] sm:$0xff]   ;;  %s165_s1 = sshll.u32 %s301_s0, 4  ;;  %s166_s1 = int_to_ptr.vmem [resolvable:$true] %s165_s1 }
  0x1d   :  { %194 = vmatprep.subr.bf16.mxu0 %v299_v0  ;;  %v45_v9 = vld [vmem:[#allocation2] sm:$0xff]  ;;  %s269_s21 = scalar_lea.vmem %s166_s1, 128  ;;  %p274_p11 = scmp.lt.s32.totalorder %s166_s1, %s166_s1 }
  0x1e   :  { %v46_v10 = vpack.c.bf16 %v45_v9, %v45_v9  ;;  %p270_p10 = scmp.ne.s32.totalorder %s166_s1, %s269_s21  ;;  %p275_p12 = scmp.lt.s32.totalorder %s269_s21, %s269_s21 }
  0x20   :  { %195 = vmatpush3.bf16.msra.mxu0 %v220_v2  ;;  %p276_p13 = por %p275_p12, %p274_p11 }
  0x21   :  { %196 = vmatprep.subr.bf16.mxu0 %v299_v0 }
  0x22   :  { %p277_p0 = pnand %p276_p13, %p270_p10 }
  0x24   :  { %197 = vmatpush3.bf16.msra.mxu0 %v221_v3 }
  0x25   :  { %198 = vmatprep.subr.bf16.mxu0 %v299_v0 }
  0x28   :  { %199 = vmatpush3.bf16.msra.mxu0 %v222_v4 }
  0x29   :  { %200 = vmatprep.subr.bf16.mxu0 %v299_v0 }
  0x2c   :  { %201 = vmatpush3.bf16.msra.mxu0 %v223_v5 }
  0x2d   :  { %202 = vmatprep.subr.bf16.mxu0 %v299_v0 }
  0x30   :  { %203 = vmatpush3.bf16.msra.mxu0 %v224_v6 }
  0x31   :  { %204 = vmatprep.subr.bf16.mxu0 %v299_v0 }
  0x34   :  { %205 = vmatpush3.bf16.msra.mxu0 %v225_v7 }
  0x35   :  { %206 = vmatprep.subr.bf16.mxu0 %v299_v0 }
  0x38   :  { %207 = vmatpush3.bf16.msra.mxu0 %v226_v8 }
  0x3b   :  { %209 = vmatmul.mubr.bf16.vlgmr.msra.gmra.mxu0 %v46_v10 }
  0xfb   :  { %v145_v11 = vpop.f32.mrf.mxu0 }
  0xfc   :  { %227 = vtanh.f32 %v145_v11 }
  0xfd   :  { %v210_v12 = vpop.f32.mrf.mxu0 }
  0xff   :  { %v148_v13 = vpop.f32.mrf.mxu0 }
 0x101   :  { %v211_v14 = vpop.f32.mrf.mxu0 }
 0x109   :  { %v228_v15 = vpop.eup %227 }
 0x10a   :  { %158 = vst [vmem:[#allocation7] sm:$0xff] %v228_v15 }
 0x10b   :  { %280 = shalt.err (!%p277_p0)
}
 0x10c   :  { %168 = dma.vmem_to_hbm [thread:$0]  %s166_s1, 128, %s328_s2, [#allocation4]  }
 0x10d   :  { %293 = dma.done.wait [#allocation4], 128  }
 0x10e   :  { %294 = vsyncadd [#allocation4], 4294967168 }
 0x10f   :  { %172 = vsyncpa [#allocation3], 1 }
 0x110   :  { %173 = vsyncpa [#allocation6], 1 }
 0x111   :  { %174 = vsyncpa [#allocation4], 1 }

</bundles_post_ra>
